<compile_context>
chip_gen: v7x
topology: tpu7x:2x2x1
jax: 0.10.0
libtpu: 0.0.40
codegen_flags: <defaults>
</compile_context>

<pallas_src>
import functools

import jax
import jax.numpy as jnp
import numpy as np
from jax import lax
from jax.experimental import pallas as pl
from jax.experimental.pallas import tpu as pltpu

BN_EPS = 1e-5


# ----------------------------------------------------------------------------- #
# Fused Pallas kernel: one grid step == one group of `bblk` batch elements
# ----------------------------------------------------------------------------- #
def _lambda_block_kernel(x_ref, w1_ref, b1_ref, wqkv_ref, bqkv_ref, e_ref,
                         w2h_ref, b2_ref, o_ref, *, heads, dim_k, dim_v, bblk, m):
    x = x_ref[...]                                          # (C, bblk*M) f32, residual

    # conv1 (1x1) + folded BN1 + ReLU — all bblk batch items in one wide matmul
    h1 = jnp.dot(w1_ref[...], x.astype(jnp.bfloat16),
                 preferred_element_type=jnp.float32) + b1_ref[...]
    h1 = jnp.maximum(h1, 0.0)                               # (C, bblk*M)

    # qkv conv (no bias) with BN_q / BN_v folded; q rows pre-permuted to (head, k)
    qkv = jnp.dot(wqkv_ref[...], h1.astype(jnp.bfloat16),
                  preferred_element_type=jnp.float32) + bqkv_ref[...]
    nq = heads * dim_k
    q_bf = qkv[:nq].astype(jnp.bfloat16)                    # (heads*dim_k, bblk*M)
    kk = qkv[nq:nq + dim_k]                                 # (dim_k, bblk*M)
    vv = qkv[nq + dim_k:]                                   # (dim_v, bblk*M)

    e = e_ref[...]                                          # (dim_k, M) f32
    w2h = w2h_ref[...]                                      # (heads, C, dim_v) f32
    b2 = b2_ref[...]                                        # (C, 1) f32

    # per-batch softmax / lambda / fused (head-apply + conv2); bblk is static
    for b in range(bblk):
        sl = slice(b * m, (b + 1) * m)                      # static, 128-aligned

        # softmax over the spatial (lane) dim; EUP reciprocal for the denominator
        kb = kk[:, sl]
        kmax = jnp.max(kb, axis=-1, keepdims=True)
        p = jnp.exp(kb - kmax)
        rsum = jnp.sum(p, axis=-1, keepdims=True)
        ks = p * pl.reciprocal(rsum, approx=True)           # (dim_k, M)

        # content + position lambdas in one f32 MXU contraction over M:
        #   lam_vk[v, k] = sum_m vv[v, m] * (softmax(k) + e)[k, m]
        kse = ks + e                                        # (dim_k, M)
        lam_vk = lax.dot_general(vv[:, sl], kse, (((1,), (1,)), ((), ())),
                                 preferred_element_type=jnp.float32)  # (dim_v, dim_k)

        # conv2 fused into the per-head apply:
        #   y = x + b2 + sum_h (w2_h @ lam_vk) @ q_h
        # The (C, dim_v)@(dim_v, dim_k) dots are tiny and independent; the four
        # (C, dim_k)@(dim_k, M) contributions accumulate straight into the output,
        # so no (C, M) intermediate is materialized and no extra dependent matmul.
        qb = q_bf[:, sl]                                    # (heads*dim_k, M) bf16
        y = b2 + x[:, sl]
        for h in range(heads):
            w_eff_h = jnp.dot(w2h[h], lam_vk,
                              preferred_element_type=jnp.float32)      # (C, dim_k)
            y = y + jnp.dot(w_eff_h.astype(jnp.bfloat16),
                            qb[h * dim_k:(h + 1) * dim_k],
                            preferred_element_type=jnp.float32)        # (C, M)

        o_ref[:, sl] = jnp.maximum(y, 0.0)


def lambda_block_forward(x_nchw, prep, *, heads=4, dim_k=16):
    B, C, H, W = x_nchw.shape
    M = H * W
    dim_v = C // heads
    Cq = prep["wqkv"].shape[0]

    # v7x: keep 2 "parallel" grid steps (both TensorCores); v5e/v6e: amortize the
    # fixed per-step cost by folding bblk batch items into each step's lanes.
    steps = 2 if (B % 2 == 0 and B >= 2) else B
    bblk = B // steps
    lane = bblk * M

    # one cheap wrapper transpose: channels on sublanes, (batch, spatial) on lanes
    x_cbm = x_nchw.reshape(B, C, M).transpose(1, 0, 2).reshape(C, B * M)

    kernel = functools.partial(_lambda_block_kernel, heads=heads, dim_k=dim_k,
                               dim_v=dim_v, bblk=bblk, m=M)

    flops = (2 * B * M * (C * C + Cq * C + dim_v * dim_k + heads * C * dim_k)
             + 2 * B * heads * C * dim_v * dim_k)
    bytes_accessed = (2 * B * C * M * 4                       # x in + y out (f32)
                      + (C * C + Cq * C) * 2                  # bf16 conv weights
                      + heads * C * dim_v * 4                 # w2 per head (f32)
                      + (2 * C + Cq) * 4 + dim_k * M * 4)     # biases + pos-embedding
    transcendentals = B * dim_k * (M + 1)                     # exp + reciprocal

    y = pl.pallas_call(
        kernel,
        out_shape=jax.ShapeDtypeStruct((C, B * M), jnp.float32),
        grid=(steps,),
        in_specs=[
            pl.BlockSpec((C, lane), lambda i: (0, i)),           # x (also residual)
            pl.BlockSpec((C, C), lambda i: (0, 0)),              # w1 (bf16, folded)
            pl.BlockSpec((C, 1), lambda i: (0, 0)),              # b1
            pl.BlockSpec((Cq, C), lambda i: (0, 0)),             # wqkv (bf16, folded, q perm)
            pl.BlockSpec((Cq, 1), lambda i: (0, 0)),             # bqkv
            pl.BlockSpec((dim_k, M), lambda i: (0, 0)),          # e (dim_k, M), lane-dense
            pl.BlockSpec((heads, C, dim_v), lambda i: (0, 0, 0)),  # w2 split per head
            pl.BlockSpec((C, 1), lambda i: (0, 0)),              # b2
        ],
        out_specs=pl.BlockSpec((C, lane), lambda i: (0, i)),
        input_output_aliases={0: 0},
        cost_estimate=pl.CostEstimate(flops=flops, transcendentals=transcendentals,
                                      bytes_accessed=bytes_accessed),
        compiler_params=pltpu.CompilerParams(dimension_semantics=("parallel",)),
    )(x_cbm, prep["w1"], prep["b1"], prep["wqkv"], prep["bqkv"], prep["e"],
      prep["w2h"], prep["b2"])
    return y.reshape(C, B, M).transpose(1, 0, 2).reshape(B, C, H, W)


# ----------------------------------------------------------------------------- #
# One-time parameter preparation (hoisted off the per-forward critical path)
# ----------------------------------------------------------------------------- #
def pos_embedding(h, w, ff):
    ch = jnp.linspace(-1.0, 1.0, h)
    cw = jnp.linspace(-1.0, 1.0, w)
    gh, gw = jnp.meshgrid(ch, cw, indexing="ij")
    rel = jnp.stack([gh, gw], axis=-1).reshape(h * w, 2)             # (M, 2)
    proj = rel @ ff * (2.0 * np.pi)                                  # (M, dim_k//2)
    return jnp.concatenate([jnp.sin(proj), jnp.cos(proj)], axis=1)   # (M, dim_k)


def fold_bn(w, b, gamma, beta, mean, var):
    scale = gamma / jnp.sqrt(var + BN_EPS)
    return w * scale[:, None], (b - mean) * scale + beta


def prepare_params(p, H, W, *, dim, dim_k=16, dim_u=1, heads=4):
    dim_v = dim // heads
    nq, nk, nv = heads * dim_k, dim_k * dim_u, dim_v * dim_u

    w1f, b1f = fold_bn(p["w1"], p["b1"], p["g1"], p["be1"], p["m1"], p["v1"])

    scale_q = p["gq"] / jnp.sqrt(p["vq"] + BN_EPS)
    bias_q = p["beq"] - p["mq"] * scale_q
    scale_v = p["gv"] / jnp.sqrt(p["vv_"] + BN_EPS)
    bias_v = p["bev"] - p["mv"] * scale_v

    wq = p["wqkv"][:nq] * scale_q[:, None]
    wk = p["wqkv"][nq:nq + nk]
    wv = p["wqkv"][nq + nk:] * scale_v[:, None]

    # permute q output channels from PyTorch's (k, head) order to (head, k) so the
    # kernel takes contiguous, sublane-aligned per-head slices of the qkv activation.
    perm = jnp.arange(nq).reshape(dim_k, heads).T.reshape(-1)
    wq = wq[perm]
    bq = bias_q[perm]

    wqkv = jnp.concatenate([wq, wk, wv], axis=0)                     # (nq+nk+nv, dim)
    bqkv = jnp.concatenate(
        [bq, jnp.zeros((nk,), jnp.float32), bias_v], axis=0)

    w2f, b2f = fold_bn(p["w2"], p["b2"], p["g2"], p["be2"], p["m2"], p["v2"])
    # conv2 is fused with the per-head lambda apply: pass w2 split per head.
    w2h = w2f.reshape(dim, heads, dim_v).transpose(1, 0, 2)          # (heads, C, dim_v)

    e_km = pos_embedding(H, W, p["ff"]).T                            # (dim_k, M)

    return dict(
        w1=w1f.astype(jnp.bfloat16), b1=b1f.reshape(dim, 1),
        wqkv=wqkv.astype(jnp.bfloat16), bqkv=bqkv.reshape(nq + nk + nv, 1),
        e=e_km,
        w2h=w2h, b2=b2f.reshape(dim, 1),
    )


def init_params(key, dim, dim_k=16, dim_u=1, heads=4, ff_sigma=10.0):
    dim_v = dim // heads
    nq = heads * dim_k
    nv = dim_v * dim_u
    qkv_out = nq + dim_k * dim_u + nv
    ks = iter(jax.random.split(key, 24))

    def nrm(shape, scale=0.1):
        return scale * jax.random.normal(next(ks), shape, dtype=jnp.float32)

    def posv(shape):
        return 0.5 + jax.random.uniform(next(ks), shape, dtype=jnp.float32)

    return dict(
        w1=nrm((dim, dim)), b1=nrm((dim,)),
        g1=1.0 + nrm((dim,)), be1=nrm((dim,)), m1=nrm((dim,)), v1=posv((dim,)),
        wqkv=nrm((qkv_out, dim)),
        gq=1.0 + nrm((nq,)), beq=nrm((nq,)), mq=nrm((nq,)), vq=posv((nq,)),
        gv=1.0 + nrm((nv,)), bev=nrm((nv,)), mv=nrm((nv,)), vv_=posv((nv,)),
        ff=ff_sigma * jax.random.normal(next(ks), (2, dim_k // 2), dtype=jnp.float32),
        w2=nrm((dim, dim)), b2=nrm((dim,)),
        g2=1.0 + nrm((dim,)), be2=nrm((dim,)), m2=nrm((dim,)), v2=posv((dim,)),
    )


# ----------------------------------------------------------------------------- #
# Pure-JAX reference (mirrors the PyTorch module math) for a sanity check
# ----------------------------------------------------------------------------- #
def reference_forward(x, p, *, dim, dim_k=16, dim_u=1, heads=4):
    B, C, H, W = x.shape
    M = H * W
    dim_v = dim // heads

    def conv1x1(x_, w, b=None):
        y = jnp.einsum("bchw,oc->bohw", x_, w)
        return y if b is None else y + b[None, :, None, None]

    def bn(x_, g, be, m, v):
        return (x_ - m[None, :, None, None]) / jnp.sqrt(v[None, :, None, None] + BN_EPS) \
            * g[None, :, None, None] + be[None, :, None, None]

    res = x
    h1 = jax.nn.relu(bn(conv1x1(x, p["w1"], p["b1"]), p["g1"], p["be1"], p["m1"], p["v1"]))
    qkv = conv1x1(h1, p["wqkv"])
    nq, nk = heads * dim_k, dim_k * dim_u
    q = bn(qkv[:, :nq], p["gq"], p["beq"], p["mq"], p["vq"])
    kk = qkv[:, nq:nq + nk]
    v = bn(qkv[:, nq + nk:], p["gv"], p["bev"], p["mv"], p["vv_"])
    q = q.reshape(B, dim_k, heads, M).transpose(0, 2, 1, 3)
    v = v.reshape(B, 1, dim_v, M)
    kk = jax.nn.softmax(kk.reshape(B, 1, dim_k, M), axis=-1)
    e = pos_embedding(H, W, p["ff"])
    content_lambda = jnp.einsum("bukm,buvm->bkv", kk, v)
    position_lambda = jnp.einsum("mk,buvm->bkv", e, v)
    content_output = jnp.einsum("bnkm,bkv->bnvm", q, content_lambda)
    position_output = jnp.einsum("bnkm,bkv->bnvm", q, position_lambda)
    out = (content_output + position_output).reshape(B, heads * dim_v, H, W)
    y = bn(conv1x1(out, p["w2"], p["b2"]), p["g2"], p["be2"], p["m2"], p["v2"]) + res
    return jax.nn.relu(y)


if __name__ == "__main__":
    dim, B, H, W = 32, 2, 16, 16
    key = jax.random.PRNGKey(0)
    kx, kp = jax.random.split(key)
    x = jax.random.normal(kx, (B, dim, H, W), dtype=jnp.float32)
    params = init_params(kp, dim)

    # one-time weight preparation (BN folding, q permutation, pos-embedding, bf16 cast)
    prep = prepare_params(params, H, W, dim=dim)

    fwd = jax.jit(functools.partial(lambda_block_forward, heads=4, dim_k=16))
    y = jax.block_until_ready(fwd(x, prep))
    assert y.shape == (B, dim, H, W) and y.dtype == jnp.float32

    y_ref = np.asarray(reference_forward(x, params, dim=dim))
    y_np = np.asarray(y)
    scale = np.max(np.abs(y_ref)) + 1e-6
    err = np.max(np.abs(y_np - y_ref)) / scale
    assert err < 5e-2, f"Pallas output mismatch: rel err {err:.4f}"

    print("KERNEL_OK")
</pallas_src>

<mosaic_0001>
module attributes {stable_mosaic.version = 11 : i64} {
  func.func @_lambda_block_kernel(%arg0: i32, %arg1: memref<32x256xf32, #tpu.memory_space<vmem>>, %arg2: memref<32x32xbf16, #tpu.memory_space<vmem>>, %arg3: memref<32x1xf32, #tpu.memory_space<vmem>>, %arg4: memref<88x32xbf16, #tpu.memory_space<vmem>>, %arg5: memref<88x1xf32, #tpu.memory_space<vmem>>, %arg6: memref<16x256xf32, #tpu.memory_space<vmem>>, %arg7: memref<4x32x8xf32, #tpu.memory_space<vmem>>, %arg8: memref<32x1xf32, #tpu.memory_space<vmem>>, %arg9: memref<32x256xf32, #tpu.memory_space<vmem>>) attributes {dimension_semantics = [#tpu.dimension_semantics<parallel>], iteration_bounds = array<i64: 2>, scalar_prefetch = 0 : i64, scratch_operands = 0 : i64, tpu.core_type = #tpu.core_type<tc>, window_params = [{transform_indices = @transform_0, window_bounds = array<i64: 32, 256>}, {pipeline_mode = #tpu.pipeline_mode<synchronous>, transform_indices = @transform_1, window_bounds = array<i64: 32, 32>}, {pipeline_mode = #tpu.pipeline_mode<synchronous>, transform_indices = @transform_2, window_bounds = array<i64: 32, 1>}, {pipeline_mode = #tpu.pipeline_mode<synchronous>, transform_indices = @transform_3, window_bounds = array<i64: 88, 32>}, {pipeline_mode = #tpu.pipeline_mode<synchronous>, transform_indices = @transform_4, window_bounds = array<i64: 88, 1>}, {pipeline_mode = #tpu.pipeline_mode<synchronous>, transform_indices = @transform_5, window_bounds = array<i64: 16, 256>}, {pipeline_mode = #tpu.pipeline_mode<synchronous>, transform_indices = @transform_6, window_bounds = array<i64: 4, 32, 8>}, {pipeline_mode = #tpu.pipeline_mode<synchronous>, transform_indices = @transform_7, window_bounds = array<i64: 32, 1>}, {transform_indices = @transform_8, window_bounds = array<i64: 32, 256>}]} {
    %c0 = arith.constant 0 : index
    %c0_0 = arith.constant 0 : index
    %0 = vector.load %arg1[%c0, %c0_0] : memref<32x256xf32, #tpu.memory_space<vmem>>, vector<32x256xf32>
    %c0_1 = arith.constant 0 : index
    %c0_2 = arith.constant 0 : index
    %1 = vector.load %arg2[%c0_1, %c0_2] : memref<32x32xbf16, #tpu.memory_space<vmem>>, vector<32x32xbf16>
    %2 = arith.truncf %0 : vector<32x256xf32> to vector<32x256xbf16>
    %cst = arith.constant dense<0.000000e+00> : vector<32x256xf32>
    %3 = tpu.matmul %1, %2, %cst {dimension_numbers = #tpu.dot_dimension_numbers<[1], [0], [0], [1], [0, 0, 1, 1], [], []>} : vector<32x32xbf16>, vector<32x256xbf16>, vector<32x256xf32> -> vector<32x256xf32>
    %c0_3 = arith.constant 0 : index
    %c0_4 = arith.constant 0 : index
    %4 = vector.load %arg3[%c0_3, %c0_4] : memref<32x1xf32, #tpu.memory_space<vmem>>, vector<32x1xf32>
    %5 = vector.broadcast %4 : vector<32x1xf32> to vector<32x256xf32>
    %6 = arith.addf %3, %5 : vector<32x256xf32>
    %cst_5 = arith.constant 0.000000e+00 : f32
    %7 = vector.broadcast %cst_5 : f32 to vector<32x256xf32>
    %8 = arith.maximumf %6, %7 : vector<32x256xf32>
    %c0_6 = arith.constant 0 : index
    %c0_7 = arith.constant 0 : index
    %9 = vector.load %arg4[%c0_6, %c0_7] : memref<88x32xbf16, #tpu.memory_space<vmem>>, vector<88x32xbf16>
    %10 = arith.truncf %8 : vector<32x256xf32> to vector<32x256xbf16>
    %cst_8 = arith.constant dense<0.000000e+00> : vector<88x256xf32>
    %11 = tpu.matmul %9, %10, %cst_8 {dimension_numbers = #tpu.dot_dimension_numbers<[1], [0], [0], [1], [0, 0, 1, 1], [], []>} : vector<88x32xbf16>, vector<32x256xbf16>, vector<88x256xf32> -> vector<88x256xf32>
    %c0_9 = arith.constant 0 : index
    %c0_10 = arith.constant 0 : index
    %12 = vector.load %arg5[%c0_9, %c0_10] : memref<88x1xf32, #tpu.memory_space<vmem>>, vector<88x1xf32>
    %13 = vector.broadcast %12 : vector<88x1xf32> to vector<88x256xf32>
    %14 = arith.addf %11, %13 : vector<88x256xf32>
    %15 = vector.extract_strided_slice %14 {offsets = [0, 0], sizes = [64, 256], strides = [1, 1]} : vector<88x256xf32> to vector<64x256xf32>
    %16 = arith.truncf %15 : vector<64x256xf32> to vector<64x256xbf16>
    %17 = vector.extract_strided_slice %14 {offsets = [64, 0], sizes = [16, 256], strides = [1, 1]} : vector<88x256xf32> to vector<16x256xf32>
    %18 = vector.extract_strided_slice %14 {offsets = [80, 0], sizes = [8, 256], strides = [1, 1]} : vector<88x256xf32> to vector<8x256xf32>
    %c0_11 = arith.constant 0 : index
    %c0_12 = arith.constant 0 : index
    %19 = vector.load %arg6[%c0_11, %c0_12] : memref<16x256xf32, #tpu.memory_space<vmem>>, vector<16x256xf32>
    %c0_13 = arith.constant 0 : index
    %c0_14 = arith.constant 0 : index
    %c0_15 = arith.constant 0 : index
    %20 = vector.load %arg7[%c0_13, %c0_14, %c0_15] : memref<4x32x8xf32, #tpu.memory_space<vmem>>, vector<4x32x8xf32>
    %c0_16 = arith.constant 0 : index
    %c0_17 = arith.constant 0 : index
    %21 = vector.load %arg8[%c0_16, %c0_17] : memref<32x1xf32, #tpu.memory_space<vmem>>, vector<32x1xf32>
    %cst_18 = arith.constant dense<0xFF800000> : vector<16xf32>
    %22 = vector.multi_reduction <maximumf>, %17, %cst_18 [1] : vector<16x256xf32> to vector<16xf32>
    %23 = vector.shape_cast %22 : vector<16xf32> to vector<16x1xf32>
    %24 = vector.broadcast %23 : vector<16x1xf32> to vector<16x256xf32>
    %25 = arith.subf %17, %24 : vector<16x256xf32>
    %26 = math.exp %25 : vector<16x256xf32>
    %cst_19 = arith.constant dense<0.000000e+00> : vector<16xf32>
    %27 = vector.multi_reduction <add>, %26, %cst_19 [1] : vector<16x256xf32> to vector<16xf32>
    %28 = vector.shape_cast %27 : vector<16xf32> to vector<16x1xf32>
    %29 = tpu.reciprocal %28 {approx = true} : vector<16x1xf32> -> vector<16x1xf32>
    %30 = vector.broadcast %29 : vector<16x1xf32> to vector<16x256xf32>
    %31 = arith.mulf %26, %30 : vector<16x256xf32>
    %32 = arith.addf %31, %19 : vector<16x256xf32>
    %cst_20 = arith.constant dense<0.000000e+00> : vector<8x16xf32>
    %33 = tpu.matmul %18, %32, %cst_20 {dimension_numbers = #tpu.dot_dimension_numbers<[1], [1], [0], [0], [0, 0, 1, 0], [], []>} : vector<8x256xf32>, vector<16x256xf32>, vector<8x16xf32> -> vector<8x16xf32>
    %34 = vector.broadcast %21 : vector<32x1xf32> to vector<32x256xf32>
    %35 = arith.addf %34, %0 : vector<32x256xf32>
    %36 = vector.extract_strided_slice %20 {offsets = [0, 0, 0], sizes = [1, 32, 8], strides = [1, 1, 1]} : vector<4x32x8xf32> to vector<1x32x8xf32>
    %37 = vector.shape_cast %36 : vector<1x32x8xf32> to vector<32x8xf32>
    %cst_21 = arith.constant dense<0.000000e+00> : vector<32x16xf32>
    %38 = tpu.matmul %37, %33, %cst_21 {dimension_numbers = #tpu.dot_dimension_numbers<[1], [0], [0], [1], [0, 0, 1, 1], [], []>} : vector<32x8xf32>, vector<8x16xf32>, vector<32x16xf32> -> vector<32x16xf32>
    %39 = arith.truncf %38 : vector<32x16xf32> to vector<32x16xbf16>
    %40 = vector.extract_strided_slice %16 {offsets = [0, 0], sizes = [16, 256], strides = [1, 1]} : vector<64x256xbf16> to vector<16x256xbf16>
    %cst_22 = arith.constant dense<0.000000e+00> : vector<32x256xf32>
    %41 = tpu.matmul %39, %40, %cst_22 {dimension_numbers = #tpu.dot_dimension_numbers<[1], [0], [0], [1], [0, 0, 1, 1], [], []>} : vector<32x16xbf16>, vector<16x256xbf16>, vector<32x256xf32> -> vector<32x256xf32>
    %42 = arith.addf %35, %41 : vector<32x256xf32>
    %43 = vector.extract_strided_slice %20 {offsets = [1, 0, 0], sizes = [1, 32, 8], strides = [1, 1, 1]} : vector<4x32x8xf32> to vector<1x32x8xf32>
    %44 = vector.shape_cast %43 : vector<1x32x8xf32> to vector<32x8xf32>
    %cst_23 = arith.constant dense<0.000000e+00> : vector<32x16xf32>
    %45 = tpu.matmul %44, %33, %cst_23 {dimension_numbers = #tpu.dot_dimension_numbers<[1], [0], [0], [1], [0, 0, 1, 1], [], []>} : vector<32x8xf32>, vector<8x16xf32>, vector<32x16xf32> -> vector<32x16xf32>
    %46 = arith.truncf %45 : vector<32x16xf32> to vector<32x16xbf16>
    %47 = vector.extract_strided_slice %16 {offsets = [16, 0], sizes = [16, 256], strides = [1, 1]} : vector<64x256xbf16> to vector<16x256xbf16>
    %cst_24 = arith.constant dense<0.000000e+00> : vector<32x256xf32>
    %48 = tpu.matmul %46, %47, %cst_24 {dimension_numbers = #tpu.dot_dimension_numbers<[1], [0], [0], [1], [0, 0, 1, 1], [], []>} : vector<32x16xbf16>, vector<16x256xbf16>, vector<32x256xf32> -> vector<32x256xf32>
    %49 = arith.addf %42, %48 : vector<32x256xf32>
    %50 = vector.extract_strided_slice %20 {offsets = [2, 0, 0], sizes = [1, 32, 8], strides = [1, 1, 1]} : vector<4x32x8xf32> to vector<1x32x8xf32>
    %51 = vector.shape_cast %50 : vector<1x32x8xf32> to vector<32x8xf32>
    %cst_25 = arith.constant dense<0.000000e+00> : vector<32x16xf32>
    %52 = tpu.matmul %51, %33, %cst_25 {dimension_numbers = #tpu.dot_dimension_numbers<[1], [0], [0], [1], [0, 0, 1, 1], [], []>} : vector<32x8xf32>, vector<8x16xf32>, vector<32x16xf32> -> vector<32x16xf32>
    %53 = arith.truncf %52 : vector<32x16xf32> to vector<32x16xbf16>
    %54 = vector.extract_strided_slice %16 {offsets = [32, 0], sizes = [16, 256], strides = [1, 1]} : vector<64x256xbf16> to vector<16x256xbf16>
    %cst_26 = arith.constant dense<0.000000e+00> : vector<32x256xf32>
    %55 = tpu.matmul %53, %54, %cst_26 {dimension_numbers = #tpu.dot_dimension_numbers<[1], [0], [0], [1], [0, 0, 1, 1], [], []>} : vector<32x16xbf16>, vector<16x256xbf16>, vector<32x256xf32> -> vector<32x256xf32>
    %56 = arith.addf %49, %55 : vector<32x256xf32>
    %57 = vector.extract_strided_slice %20 {offsets = [3, 0, 0], sizes = [1, 32, 8], strides = [1, 1, 1]} : vector<4x32x8xf32> to vector<1x32x8xf32>
    %58 = vector.shape_cast %57 : vector<1x32x8xf32> to vector<32x8xf32>
    %cst_27 = arith.constant dense<0.000000e+00> : vector<32x16xf32>
    %59 = tpu.matmul %58, %33, %cst_27 {dimension_numbers = #tpu.dot_dimension_numbers<[1], [0], [0], [1], [0, 0, 1, 1], [], []>} : vector<32x8xf32>, vector<8x16xf32>, vector<32x16xf32> -> vector<32x16xf32>
    %60 = arith.truncf %59 : vector<32x16xf32> to vector<32x16xbf16>
    %61 = vector.extract_strided_slice %16 {offsets = [48, 0], sizes = [16, 256], strides = [1, 1]} : vector<64x256xbf16> to vector<16x256xbf16>
    %cst_28 = arith.constant dense<0.000000e+00> : vector<32x256xf32>
    %62 = tpu.matmul %60, %61, %cst_28 {dimension_numbers = #tpu.dot_dimension_numbers<[1], [0], [0], [1], [0, 0, 1, 1], [], []>} : vector<32x16xbf16>, vector<16x256xbf16>, vector<32x256xf32> -> vector<32x256xf32>
    %63 = arith.addf %56, %62 : vector<32x256xf32>
    %cst_29 = arith.constant 0.000000e+00 : f32
    %64 = vector.broadcast %cst_29 : f32 to vector<32x256xf32>
    %65 = arith.maximumf %63, %64 : vector<32x256xf32>
    %c0_30 = arith.constant 0 : index
    %c0_31 = arith.constant 0 : index
    %66 = vector.load %arg9[%c0_30, %c0_31] : memref<32x256xf32, #tpu.memory_space<vmem>>, vector<32x256xf32>
    tpu.vector_store %arg9[%c0_30, %c0_31], %65 {strides = array<i32>} : memref<32x256xf32, #tpu.memory_space<vmem>>, vector<32x256xf32>,
    return
  }
  func.func @transform_0(%arg0: i32) -> (i32, i32) {
    %c0_i32 = arith.constant 0 : i32
    %c0_i32_0 = arith.constant 0 : i32
    return %c0_i32, %arg0 : i32, i32
  }
  func.func @transform_1(%arg0: i32) -> (i32, i32) {
    %c0_i32 = arith.constant 0 : i32
    %c0_i32_0 = arith.constant 0 : i32
    %c0_i32_1 = arith.constant 0 : i32
    return %c0_i32, %c0_i32_0 : i32, i32
  }
  func.func @transform_2(%arg0: i32) -> (i32, i32) {
    %c0_i32 = arith.constant 0 : i32
    %c0_i32_0 = arith.constant 0 : i32
    %c0_i32_1 = arith.constant 0 : i32
    return %c0_i32, %c0_i32_0 : i32, i32
  }
  func.func @transform_3(%arg0: i32) -> (i32, i32) {
    %c0_i32 = arith.constant 0 : i32
    %c0_i32_0 = arith.constant 0 : i32
    %c0_i32_1 = arith.constant 0 : i32
    return %c0_i32, %c0_i32_0 : i32, i32
  }
  func.func @transform_4(%arg0: i32) -> (i32, i32) {
    %c0_i32 = arith.constant 0 : i32
    %c0_i32_0 = arith.constant 0 : i32
    %c0_i32_1 = arith.constant 0 : i32
    return %c0_i32, %c0_i32_0 : i32, i32
  }
  func.func @transform_5(%arg0: i32) -> (i32, i32) {
    %c0_i32 = arith.constant 0 : i32
    %c0_i32_0 = arith.constant 0 : i32
    %c0_i32_1 = arith.constant 0 : i32
    return %c0_i32, %c0_i32_0 : i32, i32
  }
  func.func @transform_6(%arg0: i32) -> (i32, i32, i32) {
    %c0_i32 = arith.constant 0 : i32
    %c0_i32_0 = arith.constant 0 : i32
    %c0_i32_1 = arith.constant 0 : i32
    %c0_i32_2 = arith.constant 0 : i32
    return %c0_i32, %c0_i32_0, %c0_i32_1 : i32, i32, i32
  }
  func.func @transform_7(%arg0: i32) -> (i32, i32) {
    %c0_i32 = arith.constant 0 : i32
    %c0_i32_0 = arith.constant 0 : i32
    %c0_i32_1 = arith.constant 0 : i32
    return %c0_i32, %c0_i32_0 : i32, i32
  }
  func.func @transform_8(%arg0: i32) -> (i32, i32) {
    %c0_i32 = arith.constant 0 : i32
    %c0_i32_0 = arith.constant 0 : i32
    return %c0_i32, %arg0 : i32, i32
  }
}

</mosaic_0001>

<bundles_post_ra>
// kernel: lambda_block_forward.1
= control target key start
LH: loop header
LB: loop body
LE: loop exit
PB: predicated region body
PF: predicated region fallthrough
CT: control target
= control target key end

     0   :  { %s1878_s27 = smov 0   ;;  %s1880_s28 = smov 0   ;;  %s2288_s0 = inlined_call_operand.vmem [shape: f32[32,512], index: 0, kind: input, shape index: {}, may-alias: {0,8}]   ;;  %s2289_s1 = inlined_call_operand.vmem [shape: bf16[32,32], index: 1, kind: input, shape index: {}]   ;;  %s2290_s2 = inlined_call_operand.vmem [shape: f32[32,1], index: 2, kind: input, shape index: {}]   ;;  %s2291_s3 = inlined_call_operand.vmem [shape: bf16[88,32], index: 3, kind: input, shape index: {}]   ;;  %s2292_s4 = inlined_call_operand.vmem [shape: f32[88,1], index: 4, kind: input, shape index: {}]   ;;  %s2293_s5 = inlined_call_operand.vmem [shape: f32[16,256], index: 5, kind: input, shape index: {}]   ;;  %s2294_s6 = inlined_call_operand.vmem [shape: f32[4,32,8], index: 6, kind: input, shape index: {}]   ;;  %s2295_s7 = inlined_call_operand.vmem [shape: f32[32,1], index: 7, kind: input, shape index: {}]   ;;  %s2296_s8 = inlined_call_operand.vmem [shape: f32[32,512], index: 8, kind: output, shape index: {}, may-alias: {0,8}]  }
   0x1   :  { %s1882_s29 = smov 0  }
   0x2 LB: > { %s1616_s30 = sadd.s32 4294967295, %s1830_s29   ;;  %s1895_s9 = sadd.s32 1, %s1830_s29   ;;  %s1830_s29 = sphi %s1882_s29, %s2300_s29   ;;  %s1826_s28 = sphi %s1880_s28, %s2299_s28   ;;  %s1822_s27 = sphi %s1878_s27, %s2298_s27  }
   0x3   : > { %s22_s10 = ssub.s32 %s1830_s29, %s1895_s9  ;;  %s25_s11 = sadd.s32 1, %s1826_s28 }
   0x4   : > { %p23_p0 = scmp.eq.s32.totalorder %s22_s10, 0  ;;  %p32_p1 = scmp.ne.s32.totalorder %s1826_s28, %s1822_s27 }
   0x5   : > { %p33_p2 = scmp.eq.s32.totalorder %s1830_s29, 0  ;;  %p209_p3 = scmp.eq.s32.totalorder %s1616_s30, 1 }
   0x6   : > { %s1906_s12 = scalar_select %p23_p0, %s1826_s28, %s25_s11  }
   0x7   : > { %p34_p4 = por %p33_p2, %p32_p1  ;;  %p1908_p5 = por %p209_p3, %p32_p1 }
   0x8   : > { %p1619_p6 = scmp.ge.s32.totalorder %s1830_s29, 2 }
   0xa   : > { %252 = sbr.rel (%p1619_p6) target bundleno = 25 (0x19), region = 44 }
  0x11   : > { %255 = sbr.rel (!%p34_p4) target bundleno = 25 (0x19), region = 48  ;;  %s257_s14 = sand.u32 (%p34_p4), 1, %s1826_s28  }
  0x12   : > { %s1671_s15 = sshll.u32 (%p34_p4), %s1830_s29, 4  ;;  %s1620_s16 = sshll.u32 (%p34_p4), %s257_s14, 6 }
  0x13   : > { %s262_s19 = scalar_lea.vmem (%p34_p4), %s2288_s0, %s1671_s15  ;;  %s259_s20 = scalar_lea.vmem (%p34_p4), [#allocation2], %s1620_s16 }
  0x14   : > { %v275_v0 = vld [vmem:[%s262_s19] sm:$0xff] (%p34_p4)  ;;  %v277_v1 = vld [vmem:[%s262_s19 + $0x8] sm:$0xff] (%p34_p4) }
  0x15   : > { %v279_v2 = vld [vmem:[%s262_s19 + $0x20] sm:$0xff] (%p34_p4)  ;;  %276 = vst [vmem:[%s259_s20] sm:$0xff] (%p34_p4), %v275_v0  ;;  %278 = vst [vmem:[%s259_s20 + $0x8] sm:$0xff] (%p34_p4), %v277_v1  ;;  %v281_v3 = vld [vmem:[%s262_s19 + $0x28] sm:$0xff] (%p34_p4) }
  0x16   : > { %280 = vst [vmem:[%s259_s20 + $0x10] sm:$0xff] (%p34_p4), %v279_v2  ;;  %v283_v4 = vld [vmem:[%s262_s19 + $0x40] sm:$0xff] (%p34_p4)  ;;  %v285_v5 = vld [vmem:[%s262_s19 + $0x48] sm:$0xff] (%p34_p4)  ;;  %282 = vst [vmem:[%s259_s20 + $0x18] sm:$0xff] (%p34_p4), %v281_v3 }
  0x17   : > { %284 = vst [vmem:[%s259_s20 + $0x20] sm:$0xff] (%p34_p4), %v283_v4  ;;  %286 = vst [vmem:[%s259_s20 + $0x28] sm:$0xff] (%p34_p4), %v285_v5  ;;  %v287_v6 = vld [vmem:[%s262_s19 + $0x60] sm:$0xff] (%p34_p4)  ;;  %v289_v7 = vld [vmem:[%s262_s19 + $0x68] sm:$0xff] (%p34_p4) }
  0x18   : > { %288 = vst [vmem:[%s259_s20 + $0x30] sm:$0xff] %v287_v6  ;;  %290 = vst [vmem:[%s259_s20 + $0x38] sm:$0xff] %v289_v7 }
  0x19 PF: > { %p1623_p7 = scmp.ge.s32.totalorder %s1830_s29, 1  ;;  %p295_p8 = scmp.lt.s32.totalorder %s1830_s29, 3 }
  0x1b   : > { %p296_p9 = pnand %p1623_p7, %p295_p8 }
  0x1c   : > { %s302_s21 = sand.u32 (!%p296_p9), 1, %s1822_s27   ;;  %v1832_v8 = vmov (!%p296_p9), 0   ;;  %v353_v9 = vld [vmem:[%s2290_s2] sm:$0xff] (!%p296_p9)  ;;  %v354_v10 = vld [vmem:[%s2290_s2 + $0x8] sm:$0xff] (!%p296_p9)  ;;  %v355_v22 = vld [vmem:[%s2290_s2 + $0x10] sm:$0xff] (!%p296_p9)  ;;  %vm387_vm0 = vcmask (!%p296_p9), 261120  }
  0x1d   : > { %299 = sbr.rel (%p296_p9) target bundleno = 1783 (0x6f7), region = 71  ;;  %s1921_s22 = sshll.u32 (!%p296_p9), %s302_s21, 6  ;;  %426 = vmatprep.mubr.bf16.mxu1 (!%p296_p9), %v1832_v8  ;;  %1786 = vset.pattern.permute.xlu0 (!%p296_p9), %v1832_v8  ;;  %v478_v23 = vld [vmem:[%s2292_s4 + $0x40] sm:$0xff] (!%p296_p9)  ;;  %v356_v24 = vld [vmem:[%s2290_s2 + $0x18] sm:$0xff] (!%p296_p9)  ;;  %v479_v27 = vld [vmem:[%s2292_s4 + $0x48] sm:$0xff] (!%p296_p9)  ;;  %vm837_vm1 = vcmask (!%p296_p9), 64512  }
  0x1e   : > { %1787 = vset.pattern.permute.xlu1 (!%p296_p9), %v1832_v8  ;;  %s304_s10 = scalar_lea.vmem (!%p296_p9), [#allocation2], %s1921_s22  ;;  %359 = vperm.xlu0 (!%p296_p9), %1786, %v353_v9   ;;  %v1788_v26 = vld [vmem:[%s2289_s1] sm:$0xff] (!%p296_p9)   ;;  %v1789_v28 = vld [vmem:[%s2289_s1 + $0x8] sm:$0xff] (!%p296_p9)   ;;  %v1792_v63 = vld [vmem:[%s2291_s3 + $0x10] sm:$0xff] (!%p296_p9)   ;;  %vm937_vm2 = vcmask (!%p296_p9), 130048   ;;  %s2249_s27 = scalar_lea.vmem (!%p296_p9), [#allocation3], %s1921_s22 }
  0x1f   : > { %v1933_v11 = vld [vmem:[%s304_s10 + $0x8] sm:$0xff] (!%p296_p9)  ;;  %v1935_v12 = vld [vmem:[%s304_s10 + $0x18] sm:$0xff] (!%p296_p9)  ;;  %v1937_v13 = vld [vmem:[%s304_s10] sm:$0xff] (!%p296_p9)  ;;  %369 = vperm.xlu1 (!%p296_p9), %1787, %v355_v22  }
  0x20   : > { %v350_v14 = vpack.c.bf16 (!%p296_p9), %v1935_v12, %v1933_v11  ;;  %v1941_v15 = vld [vmem:[%s304_s10 + $0x10] sm:$0xff] (!%p296_p9)  ;;  %v1943_v16 = vld [vmem:[%s304_s10 + $0x28] sm:$0xff] (!%p296_p9)  ;;  %v1945_v17 = vld [vmem:[%s304_s10 + $0x38] sm:$0xff] (!%p296_p9) }
  0x21   : > { %v349_v18 = vpack.c.bf16 (!%p296_p9), %v1941_v15, %v1937_v13  ;;  %v352_v19 = vpack.c.bf16 (!%p296_p9), %v1945_v17, %v1943_v16  ;;  %v1951_v20 = vld [vmem:[%s304_s10 + $0x20] sm:$0xff] (!%p296_p9)  ;;  %v1953_v21 = vld [vmem:[%s304_s10 + $0x30] sm:$0xff] (!%p296_p9)  ;;  %v1791_v62 = vld [vmem:[%s2291_s3 + $0x8] sm:$0xff] (!%p296_p9)  }
  0x22   : > { %394 = vmatprep.subr.bf16.mxu1 (!%p296_p9), %v350_v14  ;;  %v351_v25 = vpack.c.bf16 (!%p296_p9), %v1953_v21, %v1951_v20  ;;  %364 = vperm.xlu0 (!%p296_p9), %1786, %v354_v10   ;;  %v1790_v61 = vld [vmem:[%s2291_s3] sm:$0xff] (!%p296_p9)   ;;  %v1793_v0 = vld [vmem:[%s2291_s3 + $0x18] sm:$0xff] (!%p296_p9)   ;;  %v1795_v2 = vld [vmem:[%s2291_s3 + $0x28] ss:$0 sps:$4 sm:$0xff] (!%p296_p9)  }
  0x23   : > { %395 = vmatpush1.bf16.msra.mxu1 (!%p296_p9), %v349_v18  ;;  %374 = vperm.xlu1 (!%p296_p9), %1787, %v356_v24   ;;  %v1794_v1 = vld [vmem:[%s2291_s3 + $0x20] sm:$0xff] (!%p296_p9)  }
  0x24   : > { %396 = vmatprep.subr.bf16.mxu1 %v352_v19  ;;  %s1672_s22 = sshll.u32 (%p1908_p5), %s1616_s30, 4 }
  0x25   : > { %s1528_s15 = scalar_lea.vmem (%p1908_p5), %s2296_s8, %s1672_s22 }
  0x26   : > { %523 = vperm.xlu0 %1786, %v478_v23  }
  0x27   : > { %397 = vmatpush1.bf16.msra.mxu1 %v351_v25  ;;  %528 = vperm.xlu1 %1787, %v479_v27  }
  0x2a   : > { %1628 = vmatmul.mubr.msk.bf16.vlgmr.msra.gmra.mrb[0].mxu1 %vm387_vm0, %v1788_v26 }
  0x2b   : > { %436 = vmatprep.mubr.bf16.mxu1 %v1832_v8 }
  0x32   : > { %1629 = vmatmul.mubr.msk.bf16.gmra.mrb[4].mxu1 %vm387_vm0, %v1789_v28 }
  0x33   : > { %614 = vmatprep.mubr.bf16.mxu1 %v1832_v8 }
  0x9d   : > { %v360_v29 = vpop.permute.xlu0 %359 }
  0x9e   : > { %v370_v38 = vpop.permute.xlu1 %369 }
  0xa1   : > { %v365_v33 = vpop.permute.xlu0 %364 }
  0xa2   : > { %v375_v49 = vpop.permute.xlu1 %374 }
  0xa5   : > { %v524_v28 = vpop.permute.xlu0 %523 }
  0xfd   : > { %v428_v30 = vpop.f32.mrb[0].mxu1 }
  0xfe   : > { %v429_v31 = vadd.f32 %v428_v30, %v360_v29  ;;  %v430_v32 = vpop.f32.mrb[1].mxu1 }
  0xff   : > { %v431_v34 = vadd.f32 %v430_v32, %v360_v29  ;;  %v432_v35 = vpop.f32.mrb[2].mxu1  ;;  %v529_v32 = vpop.permute.xlu1 %528 }
 0x100   : > { %v433_v36 = vadd.f32 %v432_v35, %v365_v33  ;;  %v434_v37 = vpop.f32.mrb[3].mxu1  ;;  %v447_v40 = vmax.f32 %v429_v31, 0.0 }
 0x101   : > { %v435_v39 = vadd.f32 %v434_v37, %v365_v33  ;;  %v448_v42 = vmax.f32 %v431_v34, 0.0 }
 0x102   : > { %v449_v41 = vmax.f32 %v433_v36, 0.0 }
 0x103   : > { %v450_v43 = vmax.f32 %v435_v39, 0.0 }
 0x104   : > { %v466_v44 = vpack.c.bf16 %v449_v41, %v447_v40  ;;  %v480_v40 = vld [vmem:[%s2292_s4 + $0x50] sm:$0xff] }
 0x105   : > { %v467_v45 = vpack.c.bf16 %v450_v43, %v448_v42  ;;  %v438_v46 = vpop.f32.mrb[4].mxu1  ;;  %v471_v42 = vld [vmem:[%s2292_s4 + $0x8] sm:$0xff] }
 0x106   : > { %v439_v47 = vadd.f32 %v438_v46, %v370_v38  ;;  %v440_v48 = vpop.f32.mrb[5].mxu1  ;;  %v472_v46 = vld [vmem:[%s2292_s4 + $0x10] sm:$0xff] }
 0x107   : > { %v441_v50 = vadd.f32 %v440_v48, %v370_v38  ;;  %v442_v51 = vpop.f32.mrb[6].mxu1  ;;  %582 = vmatprep.subr.bf16.mxu1 %v467_v45  ;;  %v476_v48 = vld [vmem:[%s2292_s4 + $0x30] sm:$0xff] }
 0x108   : > { %v443_v52 = vadd.f32 %v442_v51, %v375_v49  ;;  %v444_v53 = vpop.f32.mrb[7].mxu1  ;;  %583 = vmatpush1.bf16.msra.mxu1 %v466_v44  ;;  %v451_v55 = vmax.f32 %v439_v47, 0.0  ;;  %v474_v47 = vld [vmem:[%s2292_s4 + $0x20] sm:$0xff] }
 0x109   : > { %v445_v54 = vadd.f32 %v444_v53, %v375_v49  ;;  %v452_v57 = vmax.f32 %v441_v50, 0.0  ;;  %v701_v49 = vld [vmem:[%s2295_s7] sm:$0xff]  ;;  %v703_v50 = vld [vmem:[%s2295_s7 + $0x10] sm:$0xff] }
 0x10a   : > { %v453_v56 = vmax.f32 %v443_v52, 0.0 }
 0x10b   : > { %v454_v58 = vmax.f32 %v445_v54, 0.0 }
 0x10c   : > { %v468_v59 = vpack.c.bf16 %v453_v56, %v451_v55 }
 0x10d   : > { %v469_v60 = vpack.c.bf16 %v454_v58, %v452_v57 }
 0x10f   : > { %584 = vmatprep.subr.bf16.mxu1 %v469_v60 }
 0x110   : > { %585 = vmatpush1.bf16.msra.mxu1 %v468_v59 }
 0x113   : > { %1636 = vmatmul.mubr.msk.bf16.vlgmr.msra.gmra.mrb[8].mxu1 %vm387_vm0, %v1790_v61 }
 0x114   : > { %624 = vmatprep.mubr.bf16.mxu1 %v1832_v8 }
 0x11b   : > { %1637 = vmatmul.mubr.msk.bf16.gmra.mrb[12].mxu1 %vm387_vm0, %v1791_v62 }
 0x11c   : > { %634 = vmatprep.mubr.bf16.mxu1 %v1832_v8 }
 0x123   : > { %1638 = vmatmul.mubr.msk.bf16.gmra.mrb[16].mxu1 %vm387_vm0, %v1792_v63 }
 0x124   : > { %644 = vmatprep.mubr.bf16.mxu1 %v1832_v8 }
 0x12b   : > { %1639 = vmatmul.mubr.msk.bf16.gmra.mrb[20].mxu1 %vm387_vm0, %v1793_v0 }
 0x12c   : > { %654 = vmatprep.mubr.bf16.mxu1 %v1832_v8 }
 0x133   : > { %1640 = vmatmul.mubr.msk.bf16.gmra.mrb[24].mxu1 %vm387_vm0, %v1794_v1 }
 0x134   : > { %664 = vmatprep.mubr.bf16.mxu1 %v1832_v8 }
 0x13b   : > { %1641 = vmatmul.mubr.msk.bf16.gmra.mrb[28].mxu1 %vm387_vm0, %v1795_v2 }
 0x1e6   : > { %v2008_v3 = vpop.f32.mrb[8].mxu1 }
 0x1e7   : > { %v2010_v4 = vpop.f32.mrb[9].mxu1 }
 0x1e8   : > { %v2012_v5 = vpop.f32.mrb[10].mxu1 }
 0x1e9   : > { %v2014_v6 = vpop.f32.mrb[11].mxu1 }
 0x1ee   : > { %v2016_v7 = vpop.f32.mrb[12].mxu1 }
 0x1ef   : > { %v2018_v9 = vpop.f32.mrb[13].mxu1 }
 0x1f0   : > { %v2020_v10 = vpop.f32.mrb[14].mxu1 }
 0x1f1   : > { %v2022_v14 = vpop.f32.mrb[15].mxu1 }
 0x1f6   : > { %v2024_v18 = vpop.f32.mrb[16].mxu1 }
 0x1f7   : > { %v2026_v19 = vpop.f32.mrb[17].mxu1 }
 0x1f8   : > { %v2028_v22 = vpop.f32.mrb[18].mxu1 }
 0x1f9   : > { %v2030_v23 = vpop.f32.mrb[19].mxu1 }
 0x1fe   : > { %v2032_v24 = vpop.f32.mrb[20].mxu1 }
 0x1ff   : > { %v2034_v25 = vpop.f32.mrb[21].mxu1 }
 0x200   : > { %v2036_v26 = vpop.f32.mrb[22].mxu1 }
 0x201   : > { %v2038_v27 = vpop.f32.mrb[23].mxu1 }
 0x206   : > { %v656_v29 = vpop.f32.mrb[24].mxu1 }
 0x207   : > { %v657_v30 = vadd.f32 %v656_v29, %v524_v28  ;;  %v658_v31 = vpop.f32.mrb[25].mxu1 }
 0x208   : > { %v659_v33 = vadd.f32 %v658_v31, %v524_v28  ;;  %v660_v34 = vpop.f32.mrb[26].mxu1 }
 0x209   : > { %v661_v35 = vadd.f32 %v660_v34, %v529_v32  ;;  %v662_v36 = vpop.f32.mrb[27].mxu1 }
 0x20a   : > { %v663_v37 = vadd.f32 %v662_v36, %v529_v32  ;;  %v705_v38 = vmax.f32 %v657_v30, %v659_v33  ;;  %v473_v36 = vld [vmem:[%s2292_s4 + $0x18] sm:$0xff] }
 0x20c   : > { %706 = vmax.xlane.f32.xlu0 %v705_v38  ;;  %v708_v39 = vmax.f32 %v661_v35, %v663_v37  ;;  %v702_v38 = vld [vmem:[%s2295_s7 + $0x8] sm:$0xff] }
 0x20e   : > { %709 = vmax.xlane.f32.xlu1 %v708_v39  ;;  %v666_v41 = vpop.f32.mrb[28].mxu1  ;;  %v704_v39 = vld [vmem:[%s2295_s7 + $0x18] sm:$0xff] }
 0x20f   : > { %v668_v43 = vpop.f32.mrb[29].mxu1 }
 0x210   : > { %v670_v44 = vpop.f32.mrb[30].mxu1 }
 0x211   : > { %v671_v45 = vpop.f32.mrb[31].mxu1 }
 0x21f   : > { %533 = vperm.xlu1 %1787, %v480_v40  }
 0x223   : > { %488 = vperm.xlu1 %1787, %v471_v42  }
 0x227   : > { %493 = vperm.xlu1 %1787, %v472_v46  }
 0x22b   : > { %503 = vperm.xlu1 %1787, %v474_v47  }
 0x22f   : > { %513 = vperm.xlu1 %1787, %v476_v48   ;;  %v682_v48 = vld [vmem:[%s2293_s5 + $0x8] sm:$0xff] }
 0x233   : > { %811 = vperm.xlu1 %1787, %v701_v49  }
 0x237   : > { %821 = vperm.xlu1 %1787, %v703_v50  }
 0x299   : > { %v707_v51 = vpop.xlane.xlu0 %706 }
 0x29a   : > { %v711_v52 = vsub.f32 %v657_v30, %v707_v51  ;;  %v712_v53 = vsub.f32 %v659_v33, %v707_v51 }
 0x29b   : > { %v710_v54 = vpop.xlane.xlu1 %709 }
 0x29c   : > { %v715_v55 = vmul.f32 1.442695, %v711_v52  ;;  %v717_v56 = vmul.f32 1.442695, %v712_v53  ;;  %v713_v57 = vsub.f32 %v661_v35, %v710_v54  ;;  %v714_v58 = vsub.f32 %v663_v37, %v710_v54  ;;  %v470_v35 = vld [vmem:[%s2292_s4] sm:$0xff]  ;;  %v475_v37 = vld [vmem:[%s2292_s4 + $0x28] sm:$0xff] }
 0x29d   : > { %v684_v54 = vld [vmem:[%s2293_s5 + $0x18] sm:$0xff] }
 0x29e   : > { %1796 = vpow2.f32 %v715_v55  ;;  %v719_v59 = vmul.f32 1.442695, %v713_v57  ;;  %v721_v60 = vmul.f32 1.442695, %v714_v58 }
 0x29f   : > { %1798 = vpow2.f32 %v717_v56  ;;  %v534_v61 = vpop.permute.xlu1 %533 }
 0x2a0   : > { %1800 = vpow2.f32 %v719_v59  ;;  %v2061_v62 = vadd.f32 %v666_v41, %v534_v61  ;;  %v669_v63 = vadd.f32 %v668_v43, %v534_v61 }
 0x2a1   : > { %1802 = vpow2.f32 %v721_v60 }
 0x2a2   : > { %803 = vmatprep.mubr.f32.mxu0 %v669_v63 }
 0x2a3   : > { %v489_v0 = vpop.permute.xlu1 %488 }
 0x2a4   : > { %v621_v44 = vadd.f32 %v2012_v5, %v489_v0  ;;  %v623_v45 = vadd.f32 %v2014_v6, %v489_v0  ;;  %v681_v5 = vld [vmem:[%s2293_s5] sm:$0xff] }
 0x2a7   : > { %v494_v1 = vpop.permute.xlu1 %493 }
 0x2a8   : > { %v1797_v2 = vpop.eup %1796  ;;  %v2101_v56 = vadd.f32 %v2016_v7, %v494_v1  ;;  %v2104_v57 = vadd.f32 %v2018_v9, %v494_v1 }
 0x2a9   : > { %v1799_v28 = vpop.eup %1798 }
 0x2aa   : > { %v1801_v29 = vpop.eup %1800  ;;  %v723_v30 = vadd.f32 %v1799_v28, %v1797_v2 }
 0x2ab   : > { %v1803_v31 = vpop.eup %1802  ;;  %v504_v32 = vpop.permute.xlu1 %503 }
 0x2ac   : > { %v2064_v33 = vadd.f32 %v2024_v18, %v504_v32  ;;  %724 = vadd.xlane.f32.xlu0 %v723_v30  ;;  %v726_v34 = vadd.f32 %v1803_v31, %v1801_v29  ;;  %v477_v18 = vld [vmem:[%s2292_s4 + $0x38] sm:$0xff]  ;;  %v2117_v1 = vadd.f32 %v2026_v19, %v504_v32 }
 0x2af   : > { %v514_v30 = vpop.permute.xlu1 %513 }
 0x2b0   : > { %727 = vadd.xlane.f32.xlu0 %v726_v34  ;;  %v2133_v19 = vadd.f32 %v2034_v25, %v514_v30  ;;  %v693_v25 = vld [vmem:[%s2294_s6 + $0x40] sm:$0xff] }
 0x2b1   : > { %1711 = vmatprep.mubr.msk.f32.mxu1 %vm837_vm1, %v693_v25 }
 0x2c6   : > { %483 = vperm.xlu0 %1786, %v470_v35  }
 0x2ca   : > { %498 = vperm.xlu0 %1786, %v473_v36   ;;  %v2130_v36 = vadd.f32 %v2032_v24, %v514_v30  ;;  %v685_v24 = vld [vmem:[%s2294_s6] sm:$0xff] }
 0x2ce   : > { %508 = vperm.xlu0 %1786, %v475_v37  }
 0x2d2   : > { %518 = vperm.xlu0 %1786, %v477_v18  }
 0x2d6   : > { %816 = vperm.xlu0 %1786, %v702_v38   ;;  %v687_v38 = vld [vmem:[%s2294_s6 + $0x10] sm:$0xff] }
 0x2da   : > { %826 = vperm.xlu0 %1786, %v704_v39   ;;  %v688_v39 = vld [vmem:[%s2294_s6 + $0x18] sm:$0xff] }
 0x339   : > { %v725_v40 = vpop.xlane.xlu0 %724 }
 0x33a   : > { %1804 = vrcp.f32 %v725_v40  ;;  %v695_v40 = vld [vmem:[%s2294_s6 + $0x50] sm:$0xff] }
 0x33d   : > { %v728_v41 = vpop.xlane.xlu0 %727 }
 0x33e   : > { %1806 = vrcp.f32 %v728_v41  ;;  %v696_v41 = vld [vmem:[%s2294_s6 + $0x58] sm:$0xff] }
 0x344   : > { %v1805_v42 = vpop.eup %1804 }
 0x345   : > { %v484_v43 = vpop.permute.xlu0 %483  ;;  %v732_v49 = vmul.f32 %v1805_v42, %v1799_v28  ;;  %v731_v50 = vmul.f32 %v1805_v42, %v1797_v2  ;;  %v697_v42 = vld [vmem:[%s2294_s6 + $0x60] sm:$0xff] }
 0x346   : > { %v617_v46 = vadd.f32 %v2008_v3, %v484_v43  ;;  %v619_v47 = vadd.f32 %v2010_v4, %v484_v43  ;;  %v683_v3 = vld [vmem:[%s2293_s5 + $0x10] sm:$0xff]  ;;  %v698_v43 = vld [vmem:[%s2294_s6 + $0x68] sm:$0xff] }
 0x347   : > { %v736_v60 = vadd.f32 %v732_v49, %v682_v48  ;;  %v735_v63 = vadd.f32 %v731_v50, %v681_v5  ;;  %v692_v5 = vld [vmem:[%s2294_s6 + $0x38] sm:$0xff] }
 0x348   : > { %v1807_v51 = vpop.eup %1806  ;;  %v673_v52 = vpack.c.bf16 %v621_v44, %v617_v46  ;;  %v674_v53 = vpack.c.bf16 %v623_v45, %v619_v47  ;;  %v699_v44 = vld [vmem:[%s2294_s6 + $0x70] sm:$0xff]  ;;  %v700_v45 = vld [vmem:[%s2294_s6 + $0x78] sm:$0xff] }
 0x349   : > { %v499_v4 = vpop.permute.xlu0 %498  ;;  %v734_v6 = vmul.f32 %v1807_v51, %v1803_v31  ;;  %v733_v55 = vmul.f32 %v1807_v51, %v1801_v29 }
 0x34a   : > { %v2107_v58 = vadd.f32 %v2020_v10, %v499_v4  ;;  %v2110_v59 = vadd.f32 %v2022_v14, %v499_v4 }
 0x34b   : > { %v738_v61 = vadd.f32 %v734_v6, %v684_v54  ;;  %v737_v0 = vadd.f32 %v733_v55, %v683_v3  ;;  %v691_v54 = vld [vmem:[%s2294_s6 + $0x30] sm:$0xff] }
 0x34c   : > { %v675_v2 = vpack.c.bf16 %v2107_v58, %v2101_v56  ;;  %v676_v7 = vpack.c.bf16 %v2110_v59, %v2104_v57 }
 0x34d   : > { %v509_v28 = vpop.permute.xlu0 %508  ;;  %v1725_v29 = vpack.c.bf16 %v738_v61, %v736_v60  ;;  %v1727_v9 = vpack.c.bf16 %v737_v0, %v735_v63 }
 0x34e   : > { %v2120_v10 = vadd.f32 %v2028_v22, %v509_v28  ;;  %v2123_v14 = vadd.f32 %v2030_v23, %v509_v28 }
 0x34f   : > { %1726 = vmatprep.subr.bf16.mxu0 %v1725_v29 }
 0x350   : > { %v677_v31 = vpack.c.bf16 %v2120_v10, %v2064_v33  ;;  %v678_v34 = vpack.c.bf16 %v2123_v14, %v2117_v1  ;;  %1728 = vmatpush1.bf16.xpose.msra.mxu0 %v1727_v9  ;;  %v812_v33 = vpop.permute.xlu1 %811 }
 0x351   : > { %v519_v35 = vpop.permute.xlu0 %518  ;;  %v829_v14 = vadd.f32 %v812_v33, %v1937_v13  ;;  %v830_v30 = vadd.f32 %v812_v33, %v1933_v11 }
 0x352   : > { %v2136_v22 = vadd.f32 %v2036_v26, %v519_v35  ;;  %v2139_v23 = vadd.f32 %v2038_v27, %v519_v35  ;;  %v686_v27 = vld [vmem:[%s2294_s6 + $0x8] sm:$0xff] }
 0x354   : > { %v679_v32 = vpack.c.bf16 %v2136_v22, %v2130_v36  ;;  %v680_v37 = vpack.c.bf16 %v2139_v23, %v2133_v19 }
 0x355   : > { %v817_v10 = vpop.permute.xlu0 %816 }
 0x356   : > { %v832_v19 = vadd.f32 %v817_v10, %v1935_v12 }
 0x357   : > { %804 = vmatmul.mubr.f32.vlgmr.msra.gmra.mrb[0].mxu0 %v2061_v62  ;;  %v694_v62 = vld [vmem:[%s2294_s6 + $0x48] sm:$0xff] }
 0x358   : > { %1695 = vmatprep.mubr.msk.f32.mxu0 %vm837_vm1, %v685_v24  ;;  %v822_v24 = vpop.permute.xlu1 %821 }
 0x359   : > { %v827_v13 = vpop.permute.xlu0 %826  ;;  %v833_v12 = vadd.f32 %v822_v24, %v1951_v20 }
 0x42a   : > { %v805_v26 = vpop.f32.mrb[0].mxu0 }
 0x42b   : > { %v807_v18 = vpop.f32.mrb[1].mxu0  ;;  %1693 = vmatprep.subr.mxu0 %v805_v26  ;;  %1709 = vmatprep.subr.mxu1 %v805_v26 }
 0x42c   : > { %1694 = vmatpush3.msra.mxu0 %v805_v26  ;;  %1710 = vmatpush3.msra.mxu1 %v805_v26 }
 0x42d   : > { %1696 = vmatmul.mubr.msk.f32.vlgmr.msra.gmra.mrb[2].mxu0 %vm837_vm1, %v686_v27  ;;  %944 = vmatprep.subr.bf16.mxu0 %v674_v53  ;;  %v690_v53 = vld [vmem:[%s2294_s6 + $0x28] sm:$0xff]  ;;  %v834_v27 = vadd.f32 %v822_v24, %v1943_v16 }
 0x42e   : > { %1717 = vmatprep.subr.mxu1 %v805_v26  ;;  %945 = vmatpush1.bf16.msra.mxu0 %v673_v52  ;;  %v689_v52 = vld [vmem:[%s2294_s6 + $0x20] sm:$0xff] }
 0x42f   : > { %1712 = vmatmul.mubr.msk.f32.vlgmr.msra.gmra.mrb[32].mxu1 %vm837_vm1, %v694_v62  ;;  %1701 = vmatprep.subr.mxu0 %v805_v26  ;;  %v835_v62 = vadd.f32 %v827_v13, %v1953_v21 }
 0x430   : > { %1718 = vmatpush3.msra.mxu1 %v805_v26  ;;  %1698 = vmatprep.mubr.msk.f32.mxu0 %vm837_vm1, %v687_v38 }
 0x431   : > { %1699 = vmatmul.mubr.msk.f32.gmra.mrb[4].mxu0 %vm837_vm1, %v688_v39  ;;  %1714 = vmatprep.mubr.msk.f32.mxu1 %vm837_vm1, %v695_v40  ;;  %v836_v40 = vadd.f32 %v827_v13, %v1945_v17 }
 0x432   : > { %976 = vmatprep.mubr.bf16.mxu0 %v1832_v8 }
 0x433   : > { %1715 = vmatmul.mubr.msk.f32.gmra.mrb[34].mxu1 %vm837_vm1, %v696_v41 }
 0x434   : > { %1719 = vmatprep.mubr.msk.f32.mxu1 %vm837_vm1, %v697_v42 }
 0x437   : > { %1720 = vmatmul.mubr.msk.f32.vlgmr.msra.gmra.mrb[36].mxu1 %vm837_vm1, %v698_v43 }
 0x438   : > { %1722 = vmatprep.mubr.msk.f32.mxu1 %vm837_vm1, %v699_v44 }
 0x43b   : > { %1723 = vmatmul.mubr.msk.f32.gmra.mrb[38].mxu1 %vm837_vm1, %v700_v45 }
 0x500   : > { %v1697_v46 = vpop.f32.mrb[2].mxu0 }
 0x501   : > { %v916_v47 = vpop.f32.mrb[3].mxu0 }
 0x502   : > { %v935_v48 = vpack.c.bf16 %v1697_v46, %v916_v47  ;;  %v1713_v3 = vpop.f32.mrb[32].mxu1 }
 0x503   : > { %v1249_v4 = vpop.f32.mrb[33].mxu1 }
 0x504   : > { %1646 = vmatmul.mubr.msk.bf16.vlgmr.msra.gmra.mrb[8].mxu0 %vm937_vm2, %v935_v48  ;;  %v1700_v49 = vpop.f32.mrb[4].mxu0  ;;  %v1268_v6 = vpack.c.bf16 %v1713_v3, %v1249_v4 }
 0x505   : > { %1702 = vmatpush3.msra.mxu0 %v805_v26  ;;  %v926_v50 = vpop.f32.mrb[5].mxu0  ;;  %986 = vmatprep.mubr.bf16.mxu0 %v1832_v8 }
 0x506   : > { %1110 = vmatprep.subr.bf16.mxu0 %v676_v7  ;;  %v936_v51 = vpack.c.bf16 %v1700_v49, %v926_v50  ;;  %v1716_v55 = vpop.f32.mrb[34].mxu1 }
 0x507   : > { %v1259_v56 = vpop.f32.mrb[35].mxu1 }
 0x508   : > { %v1269_v57 = vpack.c.bf16 %v1716_v55, %v1259_v56 }
 0x50a   : > { %v1721_v58 = vpop.f32.mrb[36].mxu1 }
 0x50b   : > { %v1415_v59 = vpop.f32.mrb[37].mxu1 }
 0x50c   : > { %1647 = vmatmul.mubr.msk.bf16.gmra.mrb[12].mxu0 %vm937_vm2, %v936_v51  ;;  %v1434_v60 = vpack.c.bf16 %v1721_v58, %v1415_v59 }
 0x50d   : > { %1703 = vmatprep.mubr.msk.f32.mxu0 %vm837_vm1, %v689_v52 }
 0x50e   : > { %v1724_v61 = vpop.f32.mrb[38].mxu1 }
 0x50f   : > { %v1425_v63 = vpop.f32.mrb[39].mxu1 }
 0x510   : > { %v1435_v0 = vpack.c.bf16 %v1724_v61, %v1425_v63 }
 0x514   : > { %1704 = vmatmul.mubr.msk.f32.vlgmr.msra.gmra.mrb[6].mxu0 %vm837_vm1, %v690_v53 }
 0x515   : > { %1111 = vmatpush1.bf16.msra.mxu0 %v675_v2  ;;  %1706 = vmatprep.mubr.msk.f32.mxu0 %vm837_vm1, %v691_v54 }
 0x516   : > { %1276 = vmatprep.subr.bf16.mxu0 %v678_v34  ;;  %v831_v34 = vadd.f32 %v817_v10, %v1941_v15 }
 0x518   : > { %1707 = vmatmul.mubr.msk.f32.gmra.mrb[16].mxu0 %vm837_vm1, %v692_v5 }
 0x519   : > { %1142 = vmatprep.mubr.bf16.mxu0 %v1832_v8 }
 0x5e7   : > { %v1705_v2 = vpop.f32.mrb[6].mxu0 }
 0x5e8   : > { %v1083_v7 = vpop.f32.mrb[7].mxu0 }
 0x5e9   : > { %v1102_v28 = vpack.c.bf16 %v1705_v2, %v1083_v7 }
 0x5eb   : > { %1652 = vmatmul.mubr.msk.bf16.vlgmr.msra.gmra.mrb[8].mxu0 %vm937_vm2, %v1102_v28  ;;  %v1708_v29 = vpop.f32.mrb[16].mxu0 }
 0x5ec   : > { %1277 = vmatpush1.bf16.msra.mxu0 %v677_v31  ;;  %v1093_v9 = vpop.f32.mrb[17].mxu0  ;;  %1152 = vmatprep.mubr.bf16.mxu0 %v1832_v8 }
 0x5ed   : > { %1442 = vmatprep.subr.bf16.mxu0 %v680_v37  ;;  %v1103_v1 = vpack.c.bf16 %v1708_v29, %v1093_v9 }
 0x5f3   : > { %1653 = vmatmul.mubr.msk.bf16.gmra.mrb[12].mxu0 %vm937_vm2, %v1103_v1 }
 0x5f4   : > { %1308 = vmatprep.mubr.bf16.mxu0 %v1832_v8 }
 0x5fb   : > { %1658 = vmatmul.mubr.msk.bf16.vlgmr.msra.gmra.mrb[8].mxu0 %vm937_vm2, %v1268_v6 }
 0x5fc   : > { %1443 = vmatpush1.bf16.msra.mxu0 %v679_v32  ;;  %1318 = vmatprep.mubr.bf16.mxu0 %v1832_v8 }
 0x603   : > { %1659 = vmatmul.mubr.msk.bf16.gmra.mrb[12].mxu0 %vm937_vm2, %v1269_v57 }
 0x604   : > { %1474 = vmatprep.mubr.bf16.mxu0 %v1832_v8 }
 0x60b   : > { %1664 = vmatmul.mubr.msk.bf16.vlgmr.msra.gmra.mrb[8].mxu0 %vm937_vm2, %v1434_v60 }
 0x60c   : > { %1484 = vmatprep.mubr.bf16.mxu0 %v1832_v8 }
 0x613   : > { %1665 = vmatmul.mubr.msk.bf16.gmra.mrb[12].mxu0 %vm937_vm2, %v1435_v0 }
 0x6de   : > { %v1476_v31 = vpop.f32.mrb[8].mxu0 }
 0x6df   : > { %v1729_v35 = vadd.f32 %v1476_v31, %v829_v14  ;;  %v1478_v36 = vpop.f32.mrb[9].mxu0 }
 0x6e0   : > { %v1730_v22 = vadd.f32 %v1478_v36, %v830_v30  ;;  %v1480_v23 = vpop.f32.mrb[10].mxu0 }
 0x6e1   : > { %v1503_v32 = vmax.f32 %v1729_v35, 0.0  ;;  %v1731_v8 = vadd.f32 %v1480_v23, %v831_v34  ;;  %v1482_v37 = vpop.f32.mrb[11].mxu0 }
 0x6e2   : > { %v1504_v25 = vmax.f32 %v1730_v22, 0.0  ;;  %v1732_v26 = vadd.f32 %v1482_v37, %v832_v19 }
 0x6e3   : > { %1511 = vst [vmem:[%s2249_s27] sm:$0xff] %v1503_v32  ;;  %v1505_v11 = vmax.f32 %v1731_v8, 0.0 }
 0x6e4   : > { %1512 = vst [vmem:[%s2249_s27 + $0x8] sm:$0xff] %v1504_v25  ;;  %v1506_v15 = vmax.f32 %v1732_v26, 0.0 }
 0x6e5   : > { %1513 = vst [vmem:[%s2249_s27 + $0x10] sm:$0xff] %v1505_v11 }
 0x6e6   : > { %1514 = vst [vmem:[%s2249_s27 + $0x18] sm:$0xff] %v1506_v15  ;;  %v1486_v18 = vpop.f32.mrb[12].mxu0 }
 0x6e7   : > { %v1733_v38 = vadd.f32 %v1486_v18, %v833_v12  ;;  %v1488_v39 = vpop.f32.mrb[13].mxu0 }
 0x6e8   : > { %v1734_v41 = vadd.f32 %v1488_v39, %v834_v27  ;;  %v1490_v42 = vpop.f32.mrb[14].mxu0  ;;  %1525 = sbr.rel (!%p1908_p5) target bundleno = 1783 (0x6f7), region = 79 }
 0x6e9   : > { %v1507_v43 = vmax.f32 %v1733_v38, 0.0  ;;  %v1735_v44 = vadd.f32 %v1490_v42, %v835_v62  ;;  %v1492_v20 = vpop.f32.mrb[15].mxu0 }
 0x6ea   : > { %v1508_v45 = vmax.f32 %v1734_v41, 0.0  ;;  %v1736_v46 = vadd.f32 %v1492_v20, %v836_v40  ;;  %v1541_v17 = vld [vmem:[%s2249_s27] sm:$0xff] (%p1908_p5) }
 0x6eb   : > { %1515 = vst [vmem:[%s2249_s27 + $0x20] sm:$0xff] %v1507_v43  ;;  %v1509_v16 = vmax.f32 %v1735_v44, 0.0  ;;  %v1543_v21 = vld [vmem:[%s2249_s27 + $0x8] sm:$0xff] (%p1908_p5)  ;;  %1542 = vst [vmem:[%s1528_s15] sm:$0xff] (%p1908_p5), %v1541_v17 }
 0x6ec   : > { %1516 = vst [vmem:[%s2249_s27 + $0x28] sm:$0xff] %v1508_v45  ;;  %v1510_v47 = vmax.f32 %v1736_v46, 0.0  ;;  %v1545_v48 = vld [vmem:[%s2249_s27 + $0x10] sm:$0xff] (%p1908_p5)  ;;  %1544 = vst [vmem:[%s1528_s15 + $0x8] sm:$0xff] (%p1908_p5), %v1543_v21 }
 0x6ed   : > { %1517 = vst [vmem:[%s2249_s27 + $0x30] sm:$0xff] %v1509_v16  ;;  %v1547_v49 = vld [vmem:[%s2249_s27 + $0x18] sm:$0xff] (%p1908_p5)  ;;  %1546 = vst [vmem:[%s1528_s15 + $0x20] sm:$0xff] (%p1908_p5), %v1545_v48 }
 0x6ee   : > { %1518 = vst [vmem:[%s2249_s27 + $0x38] sm:$0xff] %v1510_v47  ;;  %1548 = vst [vmem:[%s1528_s15 + $0x28] sm:$0xff] (%p1908_p5), %v1547_v49 }
 0x6f2   : > { %v1549_v50 = vld [vmem:[%s2249_s27 + $0x20] sm:$0xff] }
 0x6f3   : > { %v1551_v51 = vld [vmem:[%s2249_s27 + $0x28] sm:$0xff]  ;;  %1550 = vst [vmem:[%s1528_s15 + $0x40] sm:$0xff] %v1549_v50 }
 0x6f4   : > { %1552 = vst [vmem:[%s1528_s15 + $0x48] sm:$0xff] %v1551_v51  ;;  %v1553_v52 = vld [vmem:[%s2249_s27 + $0x30] sm:$0xff] }
 0x6f5   : > { %v1555_v53 = vld [vmem:[%s2249_s27 + $0x38] sm:$0xff]  ;;  %1554 = vst [vmem:[%s1528_s15 + $0x60] sm:$0xff] %v1553_v52 }
 0x6f6   : > { %1556 = vst [vmem:[%s1528_s15 + $0x68] sm:$0xff] %v1555_v53 }
 0x6f7 PF: > { %p15_p10 = scmp.ge.s32.totalorder %s1895_s9, 4   ;;  %s2298_s27 = smov %s1826_s28 }
 0x6f8   : > { %s2299_s28 = smov %s1906_s12  ;;  %s2300_s29 = smov %s1895_s9 }
 0x6f9   :  { %17 = sbr.rel (!%p15_p10) target bundleno = 2 (0x2), region = 133 }

</bundles_post_ra>
